<compile_context>
chip_gen: v7x
topology: tpu7x:2x2x1
jax: 0.10.0
libtpu: 0.0.40
codegen_flags: <defaults>
</compile_context>

<pallas_src>
import jax
import jax.numpy as jnp
from jax.experimental import pallas as pl
from jax.experimental.pallas import tpu as pltpu

HIDDEN = 64


def _cnn_lstm_kernel(xT_ref, cw_ref, cb_ref, w1_ref, b1_ref, w2_ref, b2_ref,
                     fcw_ref, fcb_ref, out_ref):
    # Conv1d(k=3, pad=1) on a length-1 sequence == center-tap matmul; batch lives on the lane axis.
    h = jnp.maximum(
        jnp.dot(cw_ref[...], xT_ref[...], preferred_element_type=jnp.float32) + cb_ref[...],
        0.0)                                                                    # (32, TB) f32

    def cell(inp_f32, w_ref, b_ref):
        # h0 = c0 = 0  =>  the W_hh term and the forget gate are dead: c = i * g, h = o * tanh(c).
        z = jnp.dot(w_ref[...], inp_f32.astype(jnp.bfloat16),
                    preferred_element_type=jnp.float32) + b_ref[...]            # (192, TB) f32
        i = jax.nn.sigmoid(z[0:HIDDEN, :])           # sublane-aligned slices (multiples of 8 rows)
        g = jnp.tanh(z[HIDDEN:2 * HIDDEN, :])
        o = jax.nn.sigmoid(z[2 * HIDDEN:3 * HIDDEN, :])
        return o * jnp.tanh(i * g)                                              # (64, TB) f32

    h1 = cell(h, w1_ref, b1_ref)
    h2 = cell(h1, w2_ref, b2_ref)

    # Dropout(p=0.3) is identity in eval mode.
    # TODO(synk): training-mode dropout (random mask) is not implemented; forward matches model.eval().

    logits = jnp.dot(fcw_ref[...], h2.astype(jnp.bfloat16),
                     preferred_element_type=jnp.float32) + fcb_ref[...]         # (1, TB)
    out_ref[...] = jax.nn.sigmoid(logits)            # lane-dense unmasked store


def _round_up(n, m):
    return (n + m - 1) // m * m


def _cdiv(a, b):
    return -(-a // b)


def _fused_gate_params(w_ih, b_ih, b_hh, hidden=HIDDEN):
    """Fuse i/g/o gates into one (192, in) weight (bf16) and one (192, 1) bias (f32); drop dead f gate."""
    b = b_ih + b_hh

    def sl(k):
        return slice(k * hidden, (k + 1) * hidden)

    # PyTorch gate order is i, f, g, o; f is unused because c0 == 0.
    w = jnp.concatenate([w_ih[sl(0)], w_ih[sl(2)], w_ih[sl(3)]], axis=0)        # (192, in)
    bb = jnp.concatenate([b[sl(0)], b[sl(2)], b[sl(3)]], axis=0)                # (192,)
    return w.astype(jnp.bfloat16), bb.reshape(3 * hidden, 1).astype(jnp.float32)


def _resident(shape):
    """BlockSpec for a weight that stays whole & resident in VMEM across the batch grid."""
    return pl.BlockSpec(shape, lambda i: (0,) * len(shape))


def cnn_lstm_forward(x, params, *, max_tile=4096):
    """x: (B, 4) float32. Returns (B,) float32 — same as the PyTorch module in eval mode."""
    B = x.shape[0]
    B128 = _round_up(max(B, 1), 128)
    # Fewest grid steps under max_tile; tile rounded to 128 so padding waste stays < 128 rows/tile.
    # (On v7x, callers can lower max_tile to force an even number of tiles for both TensorCores.)
    ntiles = _cdiv(B128, max_tile)
    TB = _round_up(_cdiv(B128, ntiles), 128)
    B_pad = ntiles * TB

    x_p = jnp.pad(x, ((0, B_pad - B), (0, 0))) if B_pad != B else x
    xT = x_p.T.astype(jnp.bfloat16)                                             # (4, B_pad) bf16

    conv_w = params["conv_w"][:, :, 1].astype(jnp.bfloat16)                     # (32, 4): center tap only
    conv_b = params["conv_b"].reshape(32, 1).astype(jnp.float32)
    w1, b1 = _fused_gate_params(params["w_ih_l0"], params["b_ih_l0"], params["b_hh_l0"])
    w2, b2 = _fused_gate_params(params["w_ih_l1"], params["b_ih_l1"], params["b_hh_l1"])
    fc_w = params["fc_w"].astype(jnp.bfloat16)                                  # (1, 64)
    fc_b = params["fc_b"].reshape(1, 1).astype(jnp.float32)

    weights = (conv_w, conv_b, w1, b1, w2, b2, fc_w, fc_b)
    in_specs = ([pl.BlockSpec((4, TB), lambda i: (0, i))]       # batch-tiled activations (pipelined)
                + [_resident(w.shape) for w in weights])        # weights resident in VMEM

    out = pl.pallas_call(
        _cnn_lstm_kernel,
        out_shape=jax.ShapeDtypeStruct((1, B_pad), jnp.float32),
        grid_spec=pltpu.PrefetchScalarGridSpec(
            num_scalar_prefetch=0,
            grid=(B_pad // TB,),
            in_specs=in_specs,
            out_specs=pl.BlockSpec((1, TB), lambda i: (0, i)),
        ),
        compiler_params=pltpu.CompilerParams(
            dimension_semantics=("parallel",),
        ),
    )(xT, *weights)
    return out[0, :B]                                           # drop batch padding -> (B,)


def _reference_forward(x, params):
    """Plain-JAX f32 reference of the PyTorch forward (eval mode)."""
    conv = x @ params["conv_w"][:, :, 1].T + params["conv_b"]
    h = jnp.maximum(conv, 0.0)

    def cell(inp, wih, bih, bhh):
        g = inp @ wih.T + bih + bhh
        i, f, gg, o = jnp.split(g, 4, axis=-1)
        c = jax.nn.sigmoid(i) * jnp.tanh(gg)                    # c0 = 0
        return jax.nn.sigmoid(o) * jnp.tanh(c)

    h = cell(h, params["w_ih_l0"], params["b_ih_l0"], params["b_hh_l0"])
    h = cell(h, params["w_ih_l1"], params["b_ih_l1"], params["b_hh_l1"])
    return jax.nn.sigmoid(h @ params["fc_w"].T + params["fc_b"])[:, 0]


def init_params(key):
    ks = jax.random.split(key, 12)
    s = 0.1
    return {
        "conv_w":  s * jax.random.normal(ks[0], (32, 4, 3), jnp.float32),
        "conv_b":  s * jax.random.normal(ks[1], (32,), jnp.float32),
        "w_ih_l0": s * jax.random.normal(ks[2], (256, 32), jnp.float32),
        "w_hh_l0": s * jax.random.normal(ks[3], (256, 64), jnp.float32),   # unused: h0 == 0
        "b_ih_l0": s * jax.random.normal(ks[4], (256,), jnp.float32),
        "b_hh_l0": s * jax.random.normal(ks[5], (256,), jnp.float32),
        "w_ih_l1": s * jax.random.normal(ks[6], (256, 64), jnp.float32),
        "w_hh_l1": s * jax.random.normal(ks[7], (256, 64), jnp.float32),   # unused: h0 == 0
        "b_ih_l1": s * jax.random.normal(ks[8], (256,), jnp.float32),
        "b_hh_l1": s * jax.random.normal(ks[9], (256,), jnp.float32),
        "fc_w":    s * jax.random.normal(ks[10], (1, 64), jnp.float32),
        "fc_b":    s * jax.random.normal(ks[11], (1,), jnp.float32),
    }


if __name__ == "__main__":
    key = jax.random.PRNGKey(0)
    k_x, k_p = jax.random.split(key)
    B = 8
    x = jax.random.normal(k_x, (B, 4), jnp.float32)             # module input: (batch, 4)
    params = init_params(k_p)

    out = jax.block_until_ready(cnn_lstm_forward(x, params))
    ref = _reference_forward(x, params)

    assert out.shape == (B,), out.shape
    # bf16 MXU operands with f32 accumulation -> loosen tolerance vs the f32 reference.
    assert jnp.allclose(out, ref, atol=1e-2, rtol=1e-2), (out, ref)
    print("KERNEL_OK")
</pallas_src>

<mosaic_0001>
module attributes {stable_mosaic.version = 11 : i64} {
  func.func @_cnn_lstm_kernel(%arg0: i32, %arg1: memref<4x128xbf16, #tpu.memory_space<vmem>>, %arg2: memref<32x4xbf16, #tpu.memory_space<vmem>>, %arg3: memref<32x1xf32, #tpu.memory_space<vmem>>, %arg4: memref<192x32xbf16, #tpu.memory_space<vmem>>, %arg5: memref<192x1xf32, #tpu.memory_space<vmem>>, %arg6: memref<192x64xbf16, #tpu.memory_space<vmem>>, %arg7: memref<192x1xf32, #tpu.memory_space<vmem>>, %arg8: memref<1x64xbf16, #tpu.memory_space<vmem>>, %arg9: memref<1x1xf32, #tpu.memory_space<vmem>>, %arg10: memref<1x128xf32, #tpu.memory_space<vmem>>) attributes {dimension_semantics = [#tpu.dimension_semantics<parallel>], iteration_bounds = array<i64: 1>, scalar_prefetch = 0 : i64, scratch_operands = 0 : i64, tpu.core_type = #tpu.core_type<tc>, window_params = [{transform_indices = @transform_0, window_bounds = array<i64: 4, 128>}, {pipeline_mode = #tpu.pipeline_mode<synchronous>, transform_indices = @transform_1, window_bounds = array<i64: 32, 4>}, {pipeline_mode = #tpu.pipeline_mode<synchronous>, transform_indices = @transform_2, window_bounds = array<i64: 32, 1>}, {pipeline_mode = #tpu.pipeline_mode<synchronous>, transform_indices = @transform_3, window_bounds = array<i64: 192, 32>}, {pipeline_mode = #tpu.pipeline_mode<synchronous>, transform_indices = @transform_4, window_bounds = array<i64: 192, 1>}, {pipeline_mode = #tpu.pipeline_mode<synchronous>, transform_indices = @transform_5, window_bounds = array<i64: 192, 64>}, {pipeline_mode = #tpu.pipeline_mode<synchronous>, transform_indices = @transform_6, window_bounds = array<i64: 192, 1>}, {pipeline_mode = #tpu.pipeline_mode<synchronous>, transform_indices = @transform_7, window_bounds = array<i64: 1, 64>}, {pipeline_mode = #tpu.pipeline_mode<synchronous>, transform_indices = @transform_8, window_bounds = array<i64: 1, 1>}, {transform_indices = @transform_9, window_bounds = array<i64: 1, 128>}]} {
    %c0 = arith.constant 0 : index
    %c0_0 = arith.constant 0 : index
    %0 = vector.load %arg2[%c0, %c0_0] : memref<32x4xbf16, #tpu.memory_space<vmem>>, vector<32x4xbf16>
    %c0_1 = arith.constant 0 : index
    %c0_2 = arith.constant 0 : index
    %1 = vector.load %arg1[%c0_1, %c0_2] : memref<4x128xbf16, #tpu.memory_space<vmem>>, vector<4x128xbf16>
    %cst = arith.constant dense<0.000000e+00> : vector<32x128xf32>
    %2 = tpu.matmul %0, %1, %cst {dimension_numbers = #tpu.dot_dimension_numbers<[1], [0], [0], [1], [0, 0, 1, 1], [], []>} : vector<32x4xbf16>, vector<4x128xbf16>, vector<32x128xf32> -> vector<32x128xf32>
    %c0_3 = arith.constant 0 : index
    %c0_4 = arith.constant 0 : index
    %3 = vector.load %arg3[%c0_3, %c0_4] : memref<32x1xf32, #tpu.memory_space<vmem>>, vector<32x1xf32>
    %4 = vector.broadcast %3 : vector<32x1xf32> to vector<32x128xf32>
    %5 = arith.addf %2, %4 : vector<32x128xf32>
    %cst_5 = arith.constant 0.000000e+00 : f32
    %6 = vector.broadcast %cst_5 : f32 to vector<32x128xf32>
    %7 = arith.maximumf %5, %6 : vector<32x128xf32>
    %c0_6 = arith.constant 0 : index
    %c0_7 = arith.constant 0 : index
    %8 = vector.load %arg4[%c0_6, %c0_7] : memref<192x32xbf16, #tpu.memory_space<vmem>>, vector<192x32xbf16>
    %9 = arith.truncf %7 : vector<32x128xf32> to vector<32x128xbf16>
    %cst_8 = arith.constant dense<0.000000e+00> : vector<192x128xf32>
    %10 = tpu.matmul %8, %9, %cst_8 {dimension_numbers = #tpu.dot_dimension_numbers<[1], [0], [0], [1], [0, 0, 1, 1], [], []>} : vector<192x32xbf16>, vector<32x128xbf16>, vector<192x128xf32> -> vector<192x128xf32>
    %c0_9 = arith.constant 0 : index
    %c0_10 = arith.constant 0 : index
    %11 = vector.load %arg5[%c0_9, %c0_10] : memref<192x1xf32, #tpu.memory_space<vmem>>, vector<192x1xf32>
    %12 = vector.broadcast %11 : vector<192x1xf32> to vector<192x128xf32>
    %13 = arith.addf %10, %12 : vector<192x128xf32>
    %14 = vector.extract_strided_slice %13 {offsets = [0, 0], sizes = [64, 128], strides = [1, 1]} : vector<192x128xf32> to vector<64x128xf32>
    %15 = arith.negf %14 : vector<64x128xf32>
    %16 = math.exp %15 : vector<64x128xf32>
    %cst_11 = arith.constant 1.000000e+00 : f32
    %17 = vector.broadcast %cst_11 : f32 to vector<64x128xf32>
    %18 = arith.addf %17, %16 : vector<64x128xf32>
    %19 = arith.divf %17, %18 : vector<64x128xf32>
    %20 = vector.extract_strided_slice %13 {offsets = [64, 0], sizes = [64, 128], strides = [1, 1]} : vector<192x128xf32> to vector<64x128xf32>
    %21 = math.tanh %20 : vector<64x128xf32>
    %22 = vector.extract_strided_slice %13 {offsets = [128, 0], sizes = [64, 128], strides = [1, 1]} : vector<192x128xf32> to vector<64x128xf32>
    %23 = arith.negf %22 : vector<64x128xf32>
    %24 = math.exp %23 : vector<64x128xf32>
    %cst_12 = arith.constant 1.000000e+00 : f32
    %25 = vector.broadcast %cst_12 : f32 to vector<64x128xf32>
    %26 = arith.addf %25, %24 : vector<64x128xf32>
    %27 = arith.divf %25, %26 : vector<64x128xf32>
    %28 = arith.mulf %19, %21 : vector<64x128xf32>
    %29 = math.tanh %28 : vector<64x128xf32>
    %30 = arith.mulf %27, %29 : vector<64x128xf32>
    %c0_13 = arith.constant 0 : index
    %c0_14 = arith.constant 0 : index
    %31 = vector.load %arg6[%c0_13, %c0_14] : memref<192x64xbf16, #tpu.memory_space<vmem>>, vector<192x64xbf16>
    %32 = arith.truncf %30 : vector<64x128xf32> to vector<64x128xbf16>
    %cst_15 = arith.constant dense<0.000000e+00> : vector<192x128xf32>
    %33 = tpu.matmul %31, %32, %cst_15 {dimension_numbers = #tpu.dot_dimension_numbers<[1], [0], [0], [1], [0, 0, 1, 1], [], []>} : vector<192x64xbf16>, vector<64x128xbf16>, vector<192x128xf32> -> vector<192x128xf32>
    %c0_16 = arith.constant 0 : index
    %c0_17 = arith.constant 0 : index
    %34 = vector.load %arg7[%c0_16, %c0_17] : memref<192x1xf32, #tpu.memory_space<vmem>>, vector<192x1xf32>
    %35 = vector.broadcast %34 : vector<192x1xf32> to vector<192x128xf32>
    %36 = arith.addf %33, %35 : vector<192x128xf32>
    %37 = vector.extract_strided_slice %36 {offsets = [0, 0], sizes = [64, 128], strides = [1, 1]} : vector<192x128xf32> to vector<64x128xf32>
    %38 = arith.negf %37 : vector<64x128xf32>
    %39 = math.exp %38 : vector<64x128xf32>
    %cst_18 = arith.constant 1.000000e+00 : f32
    %40 = vector.broadcast %cst_18 : f32 to vector<64x128xf32>
    %41 = arith.addf %40, %39 : vector<64x128xf32>
    %42 = arith.divf %40, %41 : vector<64x128xf32>
    %43 = vector.extract_strided_slice %36 {offsets = [64, 0], sizes = [64, 128], strides = [1, 1]} : vector<192x128xf32> to vector<64x128xf32>
    %44 = math.tanh %43 : vector<64x128xf32>
    %45 = vector.extract_strided_slice %36 {offsets = [128, 0], sizes = [64, 128], strides = [1, 1]} : vector<192x128xf32> to vector<64x128xf32>
    %46 = arith.negf %45 : vector<64x128xf32>
    %47 = math.exp %46 : vector<64x128xf32>
    %cst_19 = arith.constant 1.000000e+00 : f32
    %48 = vector.broadcast %cst_19 : f32 to vector<64x128xf32>
    %49 = arith.addf %48, %47 : vector<64x128xf32>
    %50 = arith.divf %48, %49 : vector<64x128xf32>
    %51 = arith.mulf %42, %44 : vector<64x128xf32>
    %52 = math.tanh %51 : vector<64x128xf32>
    %53 = arith.mulf %50, %52 : vector<64x128xf32>
    %c0_20 = arith.constant 0 : index
    %c0_21 = arith.constant 0 : index
    %54 = vector.load %arg8[%c0_20, %c0_21] : memref<1x64xbf16, #tpu.memory_space<vmem>>, vector<1x64xbf16>
    %55 = arith.truncf %53 : vector<64x128xf32> to vector<64x128xbf16>
    %cst_22 = arith.constant dense<0.000000e+00> : vector<1x128xf32>
    %56 = tpu.matmul %54, %55, %cst_22 {dimension_numbers = #tpu.dot_dimension_numbers<[1], [0], [0], [1], [0, 0, 1, 1], [], []>} : vector<1x64xbf16>, vector<64x128xbf16>, vector<1x128xf32> -> vector<1x128xf32>
    %c0_23 = arith.constant 0 : index
    %c0_24 = arith.constant 0 : index
    %57 = vector.load %arg9[%c0_23, %c0_24] : memref<1x1xf32, #tpu.memory_space<vmem>>, vector<1x1xf32>
    %58 = vector.broadcast %57 : vector<1x1xf32> to vector<1x128xf32>
    %59 = arith.addf %56, %58 : vector<1x128xf32>
    %60 = arith.negf %59 : vector<1x128xf32>
    %61 = math.exp %60 : vector<1x128xf32>
    %cst_25 = arith.constant 1.000000e+00 : f32
    %62 = vector.broadcast %cst_25 : f32 to vector<1x128xf32>
    %63 = arith.addf %62, %61 : vector<1x128xf32>
    %64 = arith.divf %62, %63 : vector<1x128xf32>
    %c0_26 = arith.constant 0 : index
    %c0_27 = arith.constant 0 : index
    %65 = vector.load %arg10[%c0_26, %c0_27] : memref<1x128xf32, #tpu.memory_space<vmem>>, vector<1x128xf32>
    tpu.vector_store %arg10[%c0_26, %c0_27], %64 {strides = array<i32>} : memref<1x128xf32, #tpu.memory_space<vmem>>, vector<1x128xf32>,
    return
  }
  func.func @transform_0(%arg0: i32) -> (i32, i32) {
    %c0_i32 = arith.constant 0 : i32
    %c0_i32_0 = arith.constant 0 : i32
    return %c0_i32, %arg0 : i32, i32
  }
  func.func @transform_1(%arg0: i32) -> (i32, i32) {
    %c0_i32 = arith.constant 0 : i32
    %c0_i32_0 = arith.constant 0 : i32
    %c0_i32_1 = arith.constant 0 : i32
    return %c0_i32, %c0_i32_0 : i32, i32
  }
  func.func @transform_2(%arg0: i32) -> (i32, i32) {
    %c0_i32 = arith.constant 0 : i32
    %c0_i32_0 = arith.constant 0 : i32
    %c0_i32_1 = arith.constant 0 : i32
    return %c0_i32, %c0_i32_0 : i32, i32
  }
  func.func @transform_3(%arg0: i32) -> (i32, i32) {
    %c0_i32 = arith.constant 0 : i32
    %c0_i32_0 = arith.constant 0 : i32
    %c0_i32_1 = arith.constant 0 : i32
    return %c0_i32, %c0_i32_0 : i32, i32
  }
  func.func @transform_4(%arg0: i32) -> (i32, i32) {
    %c0_i32 = arith.constant 0 : i32
    %c0_i32_0 = arith.constant 0 : i32
    %c0_i32_1 = arith.constant 0 : i32
    return %c0_i32, %c0_i32_0 : i32, i32
  }
  func.func @transform_5(%arg0: i32) -> (i32, i32) {
    %c0_i32 = arith.constant 0 : i32
    %c0_i32_0 = arith.constant 0 : i32
    %c0_i32_1 = arith.constant 0 : i32
    return %c0_i32, %c0_i32_0 : i32, i32
  }
  func.func @transform_6(%arg0: i32) -> (i32, i32) {
    %c0_i32 = arith.constant 0 : i32
    %c0_i32_0 = arith.constant 0 : i32
    %c0_i32_1 = arith.constant 0 : i32
    return %c0_i32, %c0_i32_0 : i32, i32
  }
  func.func @transform_7(%arg0: i32) -> (i32, i32) {
    %c0_i32 = arith.constant 0 : i32
    %c0_i32_0 = arith.constant 0 : i32
    %c0_i32_1 = arith.constant 0 : i32
    return %c0_i32, %c0_i32_0 : i32, i32
  }
  func.func @transform_8(%arg0: i32) -> (i32, i32) {
    %c0_i32 = arith.constant 0 : i32
    %c0_i32_0 = arith.constant 0 : i32
    %c0_i32_1 = arith.constant 0 : i32
    return %c0_i32, %c0_i32_0 : i32, i32
  }
  func.func @transform_9(%arg0: i32) -> (i32, i32) {
    %c0_i32 = arith.constant 0 : i32
    %c0_i32_0 = arith.constant 0 : i32
    return %c0_i32, %arg0 : i32, i32
  }
}

</mosaic_0001>

<bundles_post_ra>
// kernel: tpu_custom_call.1
= control target key start
LH: loop header
LB: loop body
LE: loop exit
PB: predicated region body
PF: predicated region fallthrough
CT: control target
= control target key end

     0   :  { %s2110_s0 = inlined_call_operand.vmem [shape: bf16[4,128], index: 0, kind: input, shape index: {}]   ;;  %s2111_s1 = inlined_call_operand.vmem [shape: bf16[32,4], index: 1, kind: input, shape index: {}]   ;;  %s2112_s2 = inlined_call_operand.vmem [shape: f32[32,1], index: 2, kind: input, shape index: {}]   ;;  %s2113_s3 = inlined_call_operand.vmem [shape: bf16[192,32], index: 3, kind: input, shape index: {}]   ;;  %s2114_s4 = inlined_call_operand.vmem [shape: f32[192,1], index: 4, kind: input, shape index: {}]   ;;  %s2115_s5 = inlined_call_operand.vmem [shape: bf16[192,64], index: 5, kind: input, shape index: {}]   ;;  %s2116_s6 = inlined_call_operand.vmem [shape: f32[192,1], index: 6, kind: input, shape index: {}]   ;;  %s2117_s7 = inlined_call_operand.vmem [shape: bf16[1,64], index: 7, kind: input, shape index: {}]   ;;  %s2118_s8 = inlined_call_operand.<no memory space> [shape: f32[1,1], index: 8, kind: input, shape index: {}]   ;;  %s2119_s9 = inlined_call_operand.hbm [shape: f32[1,128], index: 9, kind: output, shape index: {}]  }
   0x1   :  { %v14_v0 = vstv %s2118_s8 }
   0x2   :  { %15 = vst [vmem:[#allocation2] sm:$0x1] %v14_v0 }
   0x3   :  { %v40_v1 = vld [vmem:[%s2110_s0] sm:$0x3]  ;;  %vm82_vm0 = vcmask 1041408   ;;  %v43_v2 = vld [vmem:[%s2112_s2 + $0x10] sm:$0xff]  ;;  %v1723_v4 = vmov 0   ;;  %vm75_vm1 = vcmask 31744  }
   0x4   :  { %v41_v3 = vld [vmem:[%s2112_s2] sm:$0xff]  ;;  %1476 = vset.pattern.permute.xlu1 %v1723_v4  ;;  %1475 = vset.pattern.permute.xlu0 %v1723_v4  ;;  %v84_v5 = vsel %vm82_vm0, %v40_v1, 0  ;;  %v1478_v7 = vld [vmem:[%s2111_s1 + $0x8] sm:$0xff]   ;;  %v44_v8 = vld [vmem:[%s2112_s2 + $0x18] sm:$0xff] }
   0x5   :  { %v1477_v6 = vld [vmem:[%s2111_s1] sm:$0xff]   ;;  %1470 = vmatprep.subr.msk.bf16.mxu0 %vm82_vm0, %v40_v1  ;;  %57 = vperm.xlu1 %1476, %v43_v2   ;;  %v42_v9 = vld [vmem:[%s2112_s2 + $0x8] sm:$0xff]  ;;  %v168_v12 = vld [vmem:[%s2114_s4 + $0x18] sm:$0xff] }
   0x6   :  { %47 = vperm.xlu0 %1475, %v41_v3   ;;  %1393 = vmatpush3.bf16.msra.mxu0 %v84_v5  ;;  %v166_v10 = vld [vmem:[%s2114_s4 + $0x8] sm:$0xff]  ;;  %v165_v11 = vld [vmem:[%s2114_s4] sm:$0xff]  ;;  %v167_v13 = vld [vmem:[%s2114_s4 + $0x10] sm:$0xff] }
   0x7   :  { %1394 = vmatprep.mubr.msk.bf16.mxu0 %vm75_vm1, %v1477_v6  ;;  %v170_v14 = vld [vmem:[%s2114_s4 + $0x28] sm:$0xff]  ;;  %v169_v15 = vld [vmem:[%s2114_s4 + $0x20] sm:$0xff]  ;;  %v172_v16 = vld [vmem:[%s2114_s4 + $0x38] sm:$0xff] }
   0x8   :  { %v171_v17 = vld [vmem:[%s2114_s4 + $0x30] sm:$0xff]  ;;  %v182_v18 = vld [vmem:[%s2114_s4 + $0x88] sm:$0xff]  ;;  %v181_v19 = vld [vmem:[%s2114_s4 + $0x80] sm:$0xff] }
   0x9   :  { %1395 = vmatmul.mubr.msk.bf16.vlgmr.msra.gmra.mrb[0].mxu0 %vm75_vm1, %v1478_v7  ;;  %62 = vperm.xlu1 %1476, %v44_v8   ;;  %v174_v20 = vld [vmem:[%s2114_s4 + $0x48] sm:$0xff]  ;;  %v173_v21 = vld [vmem:[%s2114_s4 + $0x40] sm:$0xff]  ;;  %v184_v22 = vld [vmem:[%s2114_s4 + $0x98] sm:$0xff] }
   0xa   :  { %52 = vperm.xlu0 %1475, %v42_v9   ;;  %v183_v23 = vld [vmem:[%s2114_s4 + $0x90] sm:$0xff]  ;;  %v176_v24 = vld [vmem:[%s2114_s4 + $0x58] sm:$0xff] }
   0xb   :  { %v175_v25 = vld [vmem:[%s2114_s4 + $0x50] sm:$0xff] }
   0xd   :  { %196 = vperm.xlu1 %1476, %v166_v10  }
   0xe   :  { %191 = vperm.xlu0 %1475, %v165_v11  }
  0x11   :  { %206 = vperm.xlu1 %1476, %v168_v12  }
  0x12   :  { %201 = vperm.xlu0 %1475, %v167_v13  }
  0x15   :  { %216 = vperm.xlu1 %1476, %v170_v14  }
  0x16   :  { %211 = vperm.xlu0 %1475, %v169_v15  }
  0x19   :  { %226 = vperm.xlu1 %1476, %v172_v16  }
  0x1a   :  { %221 = vperm.xlu0 %1475, %v171_v17  }
  0x1d   :  { %276 = vperm.xlu1 %1476, %v182_v18  }
  0x1e   :  { %271 = vperm.xlu0 %1475, %v181_v19  }
  0x21   :  { %236 = vperm.xlu1 %1476, %v174_v20  }
  0x22   :  { %231 = vperm.xlu0 %1475, %v173_v21  }
  0x25   :  { %286 = vperm.xlu1 %1476, %v184_v22  }
  0x26   :  { %281 = vperm.xlu0 %1475, %v183_v23  }
  0x27   :  { %16 = vsyncpa [#allocation4], 0  ;;  %v186_v26 = vld [vmem:[%s2114_s4 + $0xa8] sm:$0xff]  ;;  %v185_v27 = vld [vmem:[%s2114_s4 + $0xa0] sm:$0xff]  ;;  %vm369_vm2 = vcmask 261120   ;;  %vm895_vm3 = vcmask 523264  }
  0x28   :  { %v178_v28 = vld [vmem:[%s2114_s4 + $0x68] sm:$0xff]  ;;  %v177_v29 = vld [vmem:[%s2114_s4 + $0x60] sm:$0xff]  ;;  %v188_v30 = vld [vmem:[%s2114_s4 + $0xb8] sm:$0xff]  ;;  %vm1725_vm4 = vmmov 0   ;;  %s1726_s13 = smov [#allocation3]  }
  0x29   :  { %246 = vperm.xlu1 %1476, %v176_v24   ;;  %v187_v31 = vld [vmem:[%s2114_s4 + $0xb0] sm:$0xff]  ;;  %v180_v32 = vld [vmem:[%s2114_s4 + $0x78] sm:$0xff]  ;;  %v692_v34 = vld [vmem:[%s2116_s6 + $0x8] sm:$0xff]  ;;  %s1260_s14 = sshll.u32 %s1726_s13, 4  ;;  %s1261_s14 = int_to_ptr.vmem [resolvable:$true] %s1260_s14 }
  0x2a   :  { %241 = vperm.xlu0 %1475, %v175_v25   ;;  %v179_v33 = vld [vmem:[%s2114_s4 + $0x70] sm:$0xff]  ;;  %v691_v35 = vld [vmem:[%s2116_s6] sm:$0xff]  ;;  %v694_v36 = vld [vmem:[%s2116_s6 + $0x18] sm:$0xff]  ;;  %s1703_s15 = scalar_lea.vmem %s1261_s14, 32  ;;  %p1704_p1 = scmp.lt.s32.totalorder %s1261_s14, %s1261_s14 }
  0x2b   :  { %v693_v37 = vld [vmem:[%s2116_s6 + $0x10] sm:$0xff]  ;;  %v696_v38 = vld [vmem:[%s2116_s6 + $0x28] sm:$0xff]  ;;  %v695_v39 = vld [vmem:[%s2116_s6 + $0x20] sm:$0xff] }
  0x2c   :  { %v698_v40 = vld [vmem:[%s2116_s6 + $0x38] sm:$0xff]  ;;  %v697_v41 = vld [vmem:[%s2116_s6 + $0x30] sm:$0xff]  ;;  %v708_v42 = vld [vmem:[%s2116_s6 + $0x88] sm:$0xff] }
  0x2d   :  { %296 = vperm.xlu1 %1476, %v186_v26   ;;  %v707_v43 = vld [vmem:[%s2116_s6 + $0x80] sm:$0xff]  ;;  %v700_v44 = vld [vmem:[%s2116_s6 + $0x48] sm:$0xff]  ;;  %v710_v46 = vld [vmem:[%s2116_s6 + $0x98] sm:$0xff] }
  0x2e   :  { %291 = vperm.xlu0 %1475, %v185_v27   ;;  %v699_v45 = vld [vmem:[%s2116_s6 + $0x40] sm:$0xff]  ;;  %v709_v47 = vld [vmem:[%s2116_s6 + $0x90] sm:$0xff]  ;;  %v702_v48 = vld [vmem:[%s2116_s6 + $0x58] sm:$0xff] }
  0x2f   :  { %v701_v49 = vld [vmem:[%s2116_s6 + $0x50] sm:$0xff]  ;;  %v712_v50 = vld [vmem:[%s2116_s6 + $0xa8] sm:$0xff]  ;;  %v711_v51 = vld [vmem:[%s2116_s6 + $0xa0] sm:$0xff] }
  0x30   :  { %v704_v52 = vld [vmem:[%s2116_s6 + $0x68] sm:$0xff]  ;;  %v703_v53 = vld [vmem:[%s2116_s6 + $0x60] sm:$0xff]  ;;  %v714_v54 = vld [vmem:[%s2116_s6 + $0xb8] sm:$0xff] }
  0x31   :  { %256 = vperm.xlu1 %1476, %v178_v28   ;;  %v713_v55 = vld [vmem:[%s2116_s6 + $0xb0] sm:$0xff]  ;;  %v706_v56 = vld [vmem:[%s2116_s6 + $0x78] sm:$0xff]  ;;  %v1194_v58 = vld [vmem:[#allocation2] sm:$0x1] }
  0x32   :  { %251 = vperm.xlu0 %1475, %v177_v29   ;;  %v705_v57 = vld [vmem:[%s2116_s6 + $0x70] sm:$0xff]  ;;  %v1479_v59 = vld [vmem:[%s2113_s3] sm:$0xff]   ;;  %v1480_v14 = vld [vmem:[%s2113_s3 + $0x8] sm:$0xff]  }
  0x33   :  { %1402 = vmatprep.mubr.msk.bf16.mxu1 %vm369_vm2, %v1479_v59  ;;  %v1481_v15 = vld [vmem:[%s2113_s3 + $0x10] sm:$0xff]   ;;  %v1482_v16 = vld [vmem:[%s2113_s3 + $0x18] sm:$0xff]   ;;  %v1483_v17 = vld [vmem:[%s2113_s3 + $0x20] sm:$0xff]  }
  0x34   :  { %v1484_v18 = vld [vmem:[%s2113_s3 + $0x28] sm:$0xff]   ;;  %v1485_v19 = vld [vmem:[%s2113_s3 + $0x30] sm:$0xff]   ;;  %v1486_v20 = vld [vmem:[%s2113_s3 + $0x38] sm:$0xff]  }
  0x35   :  { %306 = vperm.xlu1 %1476, %v188_v30   ;;  %v1487_v21 = vld [vmem:[%s2113_s3 + $0x40] sm:$0xff]   ;;  %v1488_v22 = vld [vmem:[%s2113_s3 + $0x48] sm:$0xff]   ;;  %v1489_v23 = vld [vmem:[%s2113_s3 + $0x50] sm:$0xff]  }
  0x36   :  { %301 = vperm.xlu0 %1475, %v187_v31   ;;  %v1490_v24 = vld [vmem:[%s2113_s3 + $0x58] sm:$0xff]   ;;  %v1491_v25 = vld [vmem:[%s2115_s5] sm:$0xff]  }
  0x37   :  { %1434 = vmatprep.mubr.msk.bf16.mxu0 %vm895_vm3, %v1491_v25 }
  0x39   :  { %266 = vperm.xlu1 %1476, %v180_v32  }
  0x3a   :  { %261 = vperm.xlu0 %1475, %v179_v33  }
  0x3d   :  { %722 = vperm.xlu1 %1476, %v692_v34  }
  0x3e   :  { %717 = vperm.xlu0 %1475, %v691_v35  }
  0x41   :  { %732 = vperm.xlu1 %1476, %v694_v36  }
  0x42   :  { %727 = vperm.xlu0 %1475, %v693_v37  }
  0x45   :  { %742 = vperm.xlu1 %1476, %v696_v38  }
  0x46   :  { %737 = vperm.xlu0 %1475, %v695_v39  }
  0x49   :  { %752 = vperm.xlu1 %1476, %v698_v40  }
  0x4a   :  { %747 = vperm.xlu0 %1475, %v697_v41  }
  0x4d   :  { %802 = vperm.xlu1 %1476, %v708_v42  }
  0x4e   :  { %797 = vperm.xlu0 %1475, %v707_v43  }
  0x51   :  { %762 = vperm.xlu1 %1476, %v700_v44  }
  0x52   :  { %757 = vperm.xlu0 %1475, %v699_v45  }
  0x55   :  { %812 = vperm.xlu1 %1476, %v710_v46  }
  0x56   :  { %807 = vperm.xlu0 %1475, %v709_v47  }
  0x59   :  { %772 = vperm.xlu1 %1476, %v702_v48  }
  0x5a   :  { %767 = vperm.xlu0 %1475, %v701_v49  }
  0x5d   :  { %822 = vperm.xlu1 %1476, %v712_v50  }
  0x5e   :  { %817 = vperm.xlu0 %1475, %v711_v51  }
  0x61   :  { %782 = vperm.xlu1 %1476, %v704_v52  }
  0x62   :  { %777 = vperm.xlu0 %1475, %v703_v53  }
  0x65   :  { %832 = vperm.xlu1 %1476, %v714_v54  }
  0x66   :  { %827 = vperm.xlu0 %1475, %v713_v55  }
  0x69   :  { %792 = vperm.xlu1 %1476, %v706_v56  }
  0x6a   :  { %787 = vperm.xlu0 %1475, %v705_v57  }
  0x6e   :  { %1197 = vperm.xlu0 %1475, %v1194_v58  }
  0x84   :  { %v58_v60 = vpop.permute.xlu1 %57 }
  0x85   :  { %v48_v61 = vpop.permute.xlu0 %47 }
  0x88   :  { %v63_v1 = vpop.permute.xlu1 %62 }
  0x89   :  { %v53_v4 = vpop.permute.xlu0 %52 }
  0x8c   :  { %v197_v27 = vpop.permute.xlu1 %196 }
  0x8d   :  { %v192_v26 = vpop.permute.xlu0 %191 }
  0x90   :  { %v207_v29 = vpop.permute.xlu1 %206 }
  0x91   :  { %v202_v28 = vpop.permute.xlu0 %201 }
  0x94   :  { %v217_v31 = vpop.permute.xlu1 %216 }
  0x95   :  { %v212_v30 = vpop.permute.xlu0 %211 }
  0x98   :  { %v227_v33 = vpop.permute.xlu1 %226 }
  0x99   :  { %v222_v32 = vpop.permute.xlu0 %221 }
  0x9c   :  { %v1999_v35 = vpop.permute.xlu1 %276 }
  0x9d   :  { %v1997_v34 = vpop.permute.xlu0 %271 }
  0xa0   :  { %v237_v37 = vpop.permute.xlu1 %236 }
  0xa1   :  { %v232_v36 = vpop.permute.xlu0 %231 }
  0xa4   :  { %v2003_v39 = vpop.permute.xlu1 %286 }
  0xa5   :  { %v2001_v38 = vpop.permute.xlu0 %281 }
  0xa8   :  { %v247_v46 = vpop.permute.xlu1 %246 }
  0xa9   :  { %v242_v41 = vpop.permute.xlu0 %241 }
  0xac   :  { %v2007_v56 = vpop.permute.xlu1 %296 }
  0xad   :  { %v2005_v54 = vpop.permute.xlu0 %291 }
  0xdc   :  { %v1396_v62 = vpop.f32.mrb[0].mxu0 }
  0xdd   :  { %v129_v63 = vadd.f32 %v1396_v62, %v58_v60  ;;  %v120_v0 = vpop.f32.mrb[1].mxu0 }
  0xde   :  { %v121_v2 = vadd.f32 %v120_v0, %v48_v61  ;;  %v1397_v3 = vpop.f32.mrb[2].mxu0 }
  0xdf   :  { %v132_v5 = vadd.f32 %v1397_v3, %v63_v1  ;;  %v123_v6 = vpop.f32.mrb[3].mxu0  ;;  %v137_v8 = vmax.f32 %v129_v63, 0.0 }
  0xe0   :  { %v124_v7 = vadd.f32 %v123_v6, %v53_v4  ;;  %v135_v10 = vmax.f32 %v121_v2, 0.0  ;;  %v252_v2 = vpop.permute.xlu0 %251  ;;  %v257_v6 = vpop.permute.xlu1 %256 }
  0xe1   :  { %v138_v9 = vmax.f32 %v132_v5, 0.0 }
  0xe2   :  { %v136_v11 = vmax.f32 %v124_v7, 0.0 }
  0xe3   :  { %v164_v12 = vpack.c.bf16 %v138_v9, %v137_v8 }
  0xe4   :  { %v163_v13 = vpack.c.bf16 %v136_v11, %v135_v10 }
  0xe6   :  { %1398 = vmatprep.subr.bf16.mxu1 %v163_v13 }
  0xe7   :  { %1399 = vmatpush3.bf16.msra.mxu1 %v163_v13 }
  0xe8   :  { %1400 = vmatprep.subr.bf16.mxu1 %v164_v12 }
  0xeb   :  { %1401 = vmatpush3.bf16.msra.mxu1 %v164_v12 }
  0xee   :  { %1403 = vmatmul.mubr.msk.bf16.vlgmr.msra.gmra.mrb[0].mxu1 %vm369_vm2, %v1480_v14 }
  0xef   :  { %1406 = vmatprep.mubr.msk.bf16.mxu1 %vm369_vm2, %v1481_v15 }
  0xf6   :  { %1407 = vmatmul.mubr.msk.bf16.gmra.mrb[4].mxu1 %vm369_vm2, %v1482_v16 }
  0xf7   :  { %1410 = vmatprep.mubr.msk.bf16.mxu1 %vm369_vm2, %v1483_v17  ;;  %v2009_v17 = vpop.permute.xlu0 %301 }
  0xfe   :  { %1411 = vmatmul.mubr.msk.bf16.gmra.mrb[8].mxu1 %vm369_vm2, %v1484_v18 }
  0xff   :  { %1414 = vmatprep.mubr.msk.bf16.mxu1 %vm369_vm2, %v1485_v19 }
 0x106   :  { %1415 = vmatmul.mubr.msk.bf16.gmra.mrb[12].mxu1 %vm369_vm2, %v1486_v20 }
 0x107   :  { %1418 = vmatprep.mubr.msk.bf16.mxu1 %vm369_vm2, %v1487_v21 }
 0x10e   :  { %1419 = vmatmul.mubr.msk.bf16.gmra.mrb[16].mxu1 %vm369_vm2, %v1488_v22  ;;  %v2011_v22 = vpop.permute.xlu1 %306 }
 0x10f   :  { %1422 = vmatprep.mubr.msk.bf16.mxu1 %vm369_vm2, %v1489_v23 }
 0x116   :  { %1423 = vmatmul.mubr.msk.bf16.gmra.mrb[20].mxu1 %vm369_vm2, %v1490_v24 }
 0x1c1   :  { %v1404_v40 = vpop.f32.mrb[0].mxu1 }
 0x1c2   :  { %v449_v42 = vadd.f32 %v1404_v40, %v202_v28  ;;  %v440_v43 = vpop.f32.mrb[1].mxu1 }
 0x1c3   :  { %v441_v44 = vadd.f32 %v440_v43, %v192_v26  ;;  %v1405_v45 = vpop.f32.mrb[2].mxu1 }
 0x1c4   :  { %v1298_v47 = vmul.f32 -1.442695, %v449_v42  ;;  %v452_v48 = vadd.f32 %v1405_v45, %v207_v29  ;;  %v443_v49 = vpop.f32.mrb[3].mxu1  ;;  %v262_v29 = vpop.permute.xlu0 %261 }
 0x1c5   :  { %v1296_v50 = vmul.f32 -1.442695, %v441_v44  ;;  %v444_v51 = vadd.f32 %v443_v49, %v197_v27 }
 0x1c6   :  { %1503 = vpow2.f32 %v1298_v47  ;;  %v1299_v52 = vmul.f32 -1.442695, %v452_v48 }
 0x1c7   :  { %1505 = vpow2.f32 %v1296_v50  ;;  %v1297_v53 = vmul.f32 -1.442695, %v444_v51 }
 0x1c8   :  { %1507 = vpow2.f32 %v1299_v52 }
 0x1c9   :  { %1509 = vpow2.f32 %v1297_v53  ;;  %v1408_v55 = vpop.f32.mrb[4].mxu1 }
 0x1ca   :  { %v465_v57 = vadd.f32 %v1408_v55, %v222_v32  ;;  %v456_v58 = vpop.f32.mrb[5].mxu1 }
 0x1cb   :  { %v457_v59 = vadd.f32 %v456_v58, %v212_v30  ;;  %v1409_v60 = vpop.f32.mrb[6].mxu1 }
 0x1cc   :  { %v1302_v61 = vmul.f32 -1.442695, %v465_v57  ;;  %v468_v62 = vadd.f32 %v1409_v60, %v227_v33  ;;  %v459_v63 = vpop.f32.mrb[7].mxu1 }
 0x1cd   :  { %v1300_v0 = vmul.f32 -1.442695, %v457_v59  ;;  %v460_v1 = vadd.f32 %v459_v63, %v217_v31 }
 0x1ce   :  { %1511 = vpow2.f32 %v1302_v61  ;;  %v1303_v3 = vmul.f32 -1.442695, %v468_v62 }
 0x1cf   :  { %1513 = vpow2.f32 %v1300_v0  ;;  %v1301_v4 = vmul.f32 -1.442695, %v460_v1 }
 0x1d0   :  { %v1504_v5 = vpop.eup %1503  ;;  %1515 = vpow2.f32 %v1303_v3 }
 0x1d1   :  { %v1506_v7 = vpop.eup %1505  ;;  %v561_v8 = vadd.f32 1.0, %v1504_v5  ;;  %1517 = vpow2.f32 %v1301_v4  ;;  %v1412_v9 = vpop.f32.mrb[8].mxu1 }
 0x1d2   :  { %v1508_v10 = vpop.eup %1507  ;;  %v559_v11 = vadd.f32 1.0, %v1506_v7  ;;  %v472_v12 = vpop.f32.mrb[9].mxu1  ;;  %v481_v15 = vadd.f32 %v1412_v9, %v242_v41 }
 0x1d3   :  { %v1510_v13 = vpop.eup %1509  ;;  %1519 = vrcp.f32 %v561_v8  ;;  %v562_v14 = vadd.f32 1.0, %v1508_v10  ;;  %v1413_v16 = vpop.f32.mrb[10].mxu1  ;;  %v473_v19 = vadd.f32 %v472_v12, %v232_v36 }
 0x1d4   :  { %1521 = vrcp.f32 %v559_v11  ;;  %v560_v18 = vadd.f32 1.0, %v1510_v13  ;;  %v475_v20 = vpop.f32.mrb[11].mxu1  ;;  %v484_v21 = vadd.f32 %v1413_v16, %v247_v46  ;;  %v267_v41 = vpop.permute.xlu1 %266 }
 0x1d5   :  { %1523 = vrcp.f32 %v562_v14  ;;  %v476_v23 = vadd.f32 %v475_v20, %v237_v37 }
 0x1d6   :  { %1525 = vrcp.f32 %v560_v18 }
 0x1d7   :  { %1527 = vtanh.f32 %v481_v15 }
 0x1d8   :  { %v1512_v24 = vpop.eup %1511  ;;  %1529 = vtanh.f32 %v473_v19 }
 0x1d9   :  { %v1514_v25 = vpop.eup %1513  ;;  %v565_v26 = vadd.f32 1.0, %v1512_v24  ;;  %1531 = vtanh.f32 %v484_v21  ;;  %v1416_v27 = vpop.f32.mrb[12].mxu1 }
 0x1da   :  { %v1516_v28 = vpop.eup %1515  ;;  %v563_v30 = vadd.f32 1.0, %v1514_v25  ;;  %1533 = vtanh.f32 %v476_v23  ;;  %v488_v31 = vpop.f32.mrb[13].mxu1  ;;  %v497_v36 = vadd.f32 %v1416_v27, %v262_v29 }
 0x1db   :  { %v1518_v32 = vpop.eup %1517  ;;  %1535 = vrcp.f32 %v565_v26  ;;  %v566_v33 = vadd.f32 1.0, %v1516_v28  ;;  %v1417_v40 = vpop.f32.mrb[14].mxu1  ;;  %v489_v42 = vadd.f32 %v488_v31, %v252_v2 }
 0x1dc   :  { %1537 = vrcp.f32 %v563_v30  ;;  %v564_v37 = vadd.f32 1.0, %v1518_v32  ;;  %v491_v43 = vpop.f32.mrb[15].mxu1  ;;  %v500_v45 = vadd.f32 %v1417_v40, %v267_v41 }
 0x1dd   :  { %v1520_v44 = vpop.eup %1519  ;;  %1539 = vrcp.f32 %v566_v33  ;;  %v492_v47 = vadd.f32 %v491_v43, %v257_v6 }
 0x1de   :  { %v1522_v46 = vpop.eup %1521  ;;  %1541 = vrcp.f32 %v564_v37 }
 0x1df   :  { %v1524_v48 = vpop.eup %1523  ;;  %1543 = vtanh.f32 %v497_v36 }
 0x1e0   :  { %v1526_v49 = vpop.eup %1525  ;;  %1545 = vtanh.f32 %v489_v42 }
 0x1e1   :  { %v1528_v50 = vpop.eup %1527  ;;  %1547 = vtanh.f32 %v500_v45  ;;  %v1420_v51 = vpop.f32.mrb[16].mxu1 }
 0x1e2   :  { %v1530_v52 = vpop.eup %1529  ;;  %v641_v53 = vmul.f32 %v1528_v50, %v1520_v44  ;;  %1549 = vtanh.f32 %v492_v47  ;;  %v513_v55 = vadd.f32 %v1420_v51, %v2001_v38  ;;  %v504_v57 = vpop.f32.mrb[17].mxu1 }
 0x1e3   :  { %v1532_v58 = vpop.eup %1531  ;;  %v639_v59 = vmul.f32 %v1530_v52, %v1522_v46  ;;  %v505_v60 = vadd.f32 %v504_v57, %v1997_v34  ;;  %v1421_v61 = vpop.f32.mrb[18].mxu1 }
 0x1e4   :  { %v1534_v62 = vpop.eup %1533  ;;  %v642_v63 = vmul.f32 %v1532_v58, %v1524_v48  ;;  %v1306_v0 = vmul.f32 -1.442695, %v513_v55  ;;  %v516_v1 = vadd.f32 %v1421_v61, %v2003_v39  ;;  %v507_v2 = vpop.f32.mrb[19].mxu1 }
 0x1e5   :  { %v1536_v3 = vpop.eup %1535  ;;  %v640_v4 = vmul.f32 %v1534_v62, %v1526_v49  ;;  %v1304_v5 = vmul.f32 -1.442695, %v505_v60  ;;  %v508_v6 = vadd.f32 %v507_v2, %v1999_v35 }
 0x1e6   :  { %v1538_v7 = vpop.eup %1537  ;;  %v1307_v8 = vmul.f32 -1.442695, %v516_v1  ;;  %1551 = vpow2.f32 %v1306_v0 }
 0x1e7   :  { %v1540_v38 = vpop.eup %1539  ;;  %v1305_v9 = vmul.f32 -1.442695, %v508_v6  ;;  %1553 = vpow2.f32 %v1304_v5 }
 0x1e8   :  { %v1542_v10 = vpop.eup %1541  ;;  %1555 = vpow2.f32 %v1307_v8 }
 0x1e9   :  { %v1544_v11 = vpop.eup %1543  ;;  %v1424_v34 = vpop.f32.mrb[20].mxu1  ;;  %1557 = vpow2.f32 %v1305_v9 }
 0x1ea   :  { %v1546_v12 = vpop.eup %1545  ;;  %v645_v13 = vmul.f32 %v1544_v11, %v1536_v3  ;;  %v529_v39 = vadd.f32 %v1424_v34, %v2009_v17  ;;  %v520_v14 = vpop.f32.mrb[21].mxu1  ;;  %1559 = vtanh.f32 %v641_v53  ;;  %v1492_v11 = vld [vmem:[%s2115_s5 + $0x8] sm:$0xff]   ;;  %v1493_v34 = vld [vmem:[%s2115_s5 + $0x10] sm:$0xff]  }
 0x1eb   :  { %v1548_v15 = vpop.eup %1547  ;;  %v643_v16 = vmul.f32 %v1546_v12, %v1538_v7  ;;  %v521_v35 = vadd.f32 %v520_v14, %v2005_v54  ;;  %v1425_v18 = vpop.f32.mrb[22].mxu1  ;;  %1561 = vtanh.f32 %v639_v59  ;;  %v1494_v12 = vld [vmem:[%s2115_s5 + $0x18] sm:$0xff]   ;;  %v1497_v14 = vld [vmem:[%s2115_s5 + $0x30] sm:$0xff]  }
 0x1ec   :  { %v1550_v19 = vpop.eup %1549  ;;  %v646_v20 = vmul.f32 %v1548_v15, %v1540_v38  ;;  %v1310_v21 = vmul.f32 -1.442695, %v529_v39  ;;  %v532_v23 = vadd.f32 %v1425_v18, %v2011_v22  ;;  %v523_v24 = vpop.f32.mrb[23].mxu1  ;;  %1563 = vtanh.f32 %v642_v63  ;;  %v1496_v39 = vld [vmem:[%s2115_s5 + $0x28] sm:$0xff]   ;;  %v1498_v15 = vld [vmem:[%s2115_s5 + $0x38] sm:$0xff]   ;;  %v1501_v18 = vld [vmem:[%s2115_s5 + $0x50] sm:$0xff]  }
 0x1ed   :  { %v644_v25 = vmul.f32 %v1550_v19, %v1542_v10  ;;  %v1308_v26 = vmul.f32 -1.442695, %v521_v35  ;;  %v524_v27 = vadd.f32 %v523_v24, %v2007_v56  ;;  %v1500_v35 = vld [vmem:[%s2115_s5 + $0x48] sm:$0xff]   ;;  %v1502_v19 = vld [vmem:[%s2115_s5 + $0x58] sm:$0xff]  }
 0x1ee   :  { %v1311_v17 = vmul.f32 -1.442695, %v532_v23  ;;  %1565 = vpow2.f32 %v1310_v21  ;;  %v718_v21 = vpop.permute.xlu0 %717  ;;  %v723_v23 = vpop.permute.xlu1 %722 }
 0x1ef   :  { %v1309_v28 = vmul.f32 -1.442695, %v524_v27  ;;  %1567 = vpow2.f32 %v1308_v26 }
 0x1f0   :  { %v1552_v29 = vpop.eup %1551  ;;  %1569 = vpow2.f32 %v1311_v17 }
 0x1f1   :  { %v1554_v54 = vpop.eup %1553  ;;  %v617_v30 = vadd.f32 1.0, %v1552_v29  ;;  %1571 = vpow2.f32 %v1309_v28 }
 0x1f2   :  { %v1556_v31 = vpop.eup %1555  ;;  %1573 = vtanh.f32 %v640_v4  ;;  %v615_v22 = vadd.f32 1.0, %v1554_v54  ;;  %v728_v24 = vpop.permute.xlu0 %727 }
 0x1f3   :  { %v1558_v32 = vpop.eup %1557  ;;  %1575 = vrcp.f32 %v617_v30  ;;  %v618_v33 = vadd.f32 1.0, %v1556_v31 }
 0x1f4   :  { %1577 = vrcp.f32 %v615_v22  ;;  %v616_v36 = vadd.f32 1.0, %v1558_v32  ;;  %v1560_v56 = vpop.eup %1559 }
 0x1f5   :  { %1579 = vrcp.f32 %v618_v33  ;;  %v1562_v40 = vpop.eup %1561 }
 0x1f6   :  { %1581 = vrcp.f32 %v616_v36  ;;  %v1564_v41 = vpop.eup %1563  ;;  %v738_v26 = vpop.permute.xlu0 %737 }
 0x1f7   :  { %1583 = vtanh.f32 %v645_v13  ;;  %v1495_v13 = vld [vmem:[%s2115_s5 + $0x20] sm:$0xff]  }
 0x1f8   :  { %v1566_v37 = vpop.eup %1565  ;;  %1585 = vtanh.f32 %v643_v16  ;;  %v1499_v16 = vld [vmem:[%s2115_s5 + $0x40] sm:$0xff]  }
 0x1f9   :  { %v1568_v42 = vpop.eup %1567  ;;  %1587 = vtanh.f32 %v646_v20  ;;  %v621_v43 = vadd.f32 1.0, %v1566_v37  ;;  %v1724_v20 = vmov 0.0  }
 0x1fa   :  { %v1570_v44 = vpop.eup %1569  ;;  %1589 = vtanh.f32 %v644_v25  ;;  %v619_v45 = vadd.f32 1.0, %v1568_v42  ;;  %1458 = vmatprep.subr.bf16.mxu1 %v1724_v20  ;;  %1466 = vmatprep.mubr.msk.bf16.mxu1 %vm1725_vm4, %v1724_v20  ;;  %v733_v25 = vpop.permute.xlu1 %732 }
 0x1fb   :  { %v1572_v46 = vpop.eup %1571  ;;  %1591 = vrcp.f32 %v621_v43  ;;  %v622_v47 = vadd.f32 1.0, %v1570_v44  ;;  %v748_v17 = vpop.permute.xlu0 %747 }
 0x1fc   :  { %v1574_v48 = vpop.eup %1573  ;;  %1593 = vrcp.f32 %v619_v45  ;;  %v620_v49 = vadd.f32 1.0, %v1572_v46 }
 0x1fd   :  { %v1576_v50 = vpop.eup %1575  ;;  %1595 = vrcp.f32 %v622_v47 }
 0x1fe   :  { %v1578_v51 = vpop.eup %1577  ;;  %1597 = vrcp.f32 %v620_v49  ;;  %v657_v52 = vmul.f32 %v1576_v50, %v1560_v56  ;;  %v743_v27 = vpop.permute.xlu1 %742 }
 0x1ff   :  { %v1580_v53 = vpop.eup %1579  ;;  %v655_v55 = vmul.f32 %v1578_v51, %v1562_v40  ;;  %v2067_v29 = vpop.permute.xlu0 %797 }
 0x200   :  { %v1582_v57 = vpop.eup %1581  ;;  %v658_v58 = vmul.f32 %v1580_v53, %v1564_v41 }
 0x201   :  { %v1584_v59 = vpop.eup %1583  ;;  %v656_v60 = vmul.f32 %v1582_v57, %v1574_v48 }
 0x202   :  { %v1586_v61 = vpop.eup %1585  ;;  %v688_v62 = vpack.c.bf16 %v658_v58, %v657_v52  ;;  %v753_v28 = vpop.permute.xlu1 %752 }
 0x203   :  { %v1588_v63 = vpop.eup %1587  ;;  %v687_v0 = vpack.c.bf16 %v656_v60, %v655_v55  ;;  %v758_v30 = vpop.permute.xlu0 %757 }
 0x204   :  { %v1590_v1 = vpop.eup %1589 }
 0x205   :  { %v1592_v2 = vpop.eup %1591  ;;  %1426 = vmatprep.subr.bf16.mxu0 %v687_v0 }
 0x206   :  { %v1594_v3 = vpop.eup %1593  ;;  %1427 = vmatpush3.bf16.msra.mxu0 %v687_v0  ;;  %v661_v4 = vmul.f32 %v1592_v2, %v1584_v59  ;;  %v2069_v54 = vpop.permute.xlu1 %802 }
 0x207   :  { %v1596_v5 = vpop.eup %1595  ;;  %1428 = vmatprep.subr.bf16.mxu0 %v688_v62  ;;  %v659_v6 = vmul.f32 %v1594_v3, %v1586_v61  ;;  %v2071_v22 = vpop.permute.xlu0 %807 }
 0x208   :  { %v1598_v7 = vpop.eup %1597  ;;  %v662_v8 = vmul.f32 %v1596_v5, %v1588_v63 }
 0x209   :  { %v660_v38 = vmul.f32 %v1598_v7, %v1590_v1 }
 0x20a   :  { %1429 = vmatpush3.bf16.msra.mxu0 %v688_v62  ;;  %v690_v9 = vpack.c.bf16 %v662_v8, %v661_v4  ;;  %v763_v31 = vpop.permute.xlu1 %762 }
 0x20b   :  { %v689_v10 = vpack.c.bf16 %v660_v38, %v659_v6  ;;  %v768_v36 = vpop.permute.xlu0 %767 }
 0x20d   :  { %1430 = vmatprep.subr.bf16.mxu0 %v689_v10 }
 0x20e   :  { %1431 = vmatpush3.bf16.msra.mxu0 %v689_v10  ;;  %v2073_v32 = vpop.permute.xlu1 %812 }
 0x20f   :  { %1432 = vmatprep.subr.bf16.mxu0 %v690_v9  ;;  %v2075_v50 = vpop.permute.xlu0 %817 }
 0x212   :  { %1433 = vmatpush3.bf16.msra.mxu0 %v690_v9  ;;  %v773_v42 = vpop.permute.xlu1 %772 }
 0x213   :  { %v778_v0 = vpop.permute.xlu0 %777 }
 0x215   :  { %1435 = vmatmul.mubr.msk.bf16.vlgmr.msra.gmra.mrb[4].mxu0 %vm895_vm3, %v1492_v11 }
 0x216   :  { %1438 = vmatprep.mubr.msk.bf16.mxu0 %vm895_vm3, %v1493_v34  ;;  %v2077_v52 = vpop.permute.xlu1 %822 }
 0x21a   :  { %v783_v4 = vpop.permute.xlu1 %782 }
 0x21d   :  { %1439 = vmatmul.mubr.msk.bf16.gmra.mrb[8].mxu0 %vm895_vm3, %v1494_v12 }
 0x21e   :  { %1442 = vmatprep.mubr.msk.bf16.mxu0 %vm895_vm3, %v1495_v13  ;;  %v2079_v13 = vpop.permute.xlu0 %827 }
 0x225   :  { %1443 = vmatmul.mubr.msk.bf16.gmra.mrb[12].mxu0 %vm895_vm3, %v1496_v39 }
 0x226   :  { %1446 = vmatprep.mubr.msk.bf16.mxu0 %vm895_vm3, %v1497_v14 }
 0x22d   :  { %1447 = vmatmul.mubr.msk.bf16.gmra.mrb[16].mxu0 %vm895_vm3, %v1498_v15 }
 0x22e   :  { %1450 = vmatprep.mubr.msk.bf16.mxu0 %vm895_vm3, %v1499_v16 }
 0x235   :  { %1451 = vmatmul.mubr.msk.bf16.gmra.mrb[20].mxu0 %vm895_vm3, %v1500_v35  ;;  %v2081_v35 = vpop.permute.xlu1 %832 }
 0x236   :  { %1454 = vmatprep.mubr.msk.bf16.mxu0 %vm895_vm3, %v1501_v18 }
 0x23d   :  { %1455 = vmatmul.mubr.msk.bf16.gmra.mrb[24].mxu0 %vm895_vm3, %v1502_v19 }
 0x2e8   :  { %v1436_v33 = vpop.f32.mrb[4].mxu0 }
 0x2e9   :  { %v975_v56 = vadd.f32 %v1436_v33, %v728_v24  ;;  %v966_v40 = vpop.f32.mrb[5].mxu0 }
 0x2ea   :  { %v967_v41 = vadd.f32 %v966_v40, %v718_v21  ;;  %v1437_v37 = vpop.f32.mrb[6].mxu0 }
 0x2eb   :  { %v1338_v43 = vmul.f32 -1.442695, %v975_v56  ;;  %v978_v44 = vadd.f32 %v1437_v37, %v733_v25  ;;  %v969_v45 = vpop.f32.mrb[7].mxu0  ;;  %v793_v56 = vpop.permute.xlu1 %792 }
 0x2ec   :  { %v1336_v46 = vmul.f32 -1.442695, %v967_v41  ;;  %v970_v47 = vadd.f32 %v969_v45, %v723_v23 }
 0x2ed   :  { %1599 = vpow2.f32 %v1338_v43  ;;  %v1339_v48 = vmul.f32 -1.442695, %v978_v44 }
 0x2ee   :  { %1601 = vpow2.f32 %v1336_v46  ;;  %v1337_v49 = vmul.f32 -1.442695, %v970_v47 }
 0x2ef   :  { %1603 = vpow2.f32 %v1339_v48 }
 0x2f0   :  { %1605 = vpow2.f32 %v1337_v49  ;;  %v1440_v51 = vpop.f32.mrb[8].mxu0 }
 0x2f1   :  { %v991_v53 = vadd.f32 %v1440_v51, %v748_v17  ;;  %v982_v55 = vpop.f32.mrb[9].mxu0 }
 0x2f2   :  { %v983_v57 = vadd.f32 %v982_v55, %v738_v26  ;;  %v1441_v58 = vpop.f32.mrb[10].mxu0  ;;  %v788_v26 = vpop.permute.xlu0 %787 }
 0x2f3   :  { %v1342_v59 = vmul.f32 -1.442695, %v991_v53  ;;  %v994_v60 = vadd.f32 %v1441_v58, %v753_v28  ;;  %v985_v61 = vpop.f32.mrb[11].mxu0 }
 0x2f4   :  { %v1340_v62 = vmul.f32 -1.442695, %v983_v57  ;;  %v986_v63 = vadd.f32 %v985_v61, %v743_v27 }
 0x2f5   :  { %1607 = vpow2.f32 %v1342_v59  ;;  %v1343_v1 = vmul.f32 -1.442695, %v994_v60 }
 0x2f6   :  { %1609 = vpow2.f32 %v1340_v62  ;;  %v1341_v2 = vmul.f32 -1.442695, %v986_v63 }
 0x2f7   :  { %v1600_v3 = vpop.eup %1599  ;;  %1611 = vpow2.f32 %v1343_v1 }
 0x2f8   :  { %v1602_v5 = vpop.eup %1601  ;;  %v1087_v6 = vadd.f32 1.0, %v1600_v3  ;;  %1613 = vpow2.f32 %v1341_v2  ;;  %v1444_v7 = vpop.f32.mrb[12].mxu0 }
 0x2f9   :  { %v1604_v8 = vpop.eup %1603  ;;  %v1085_v38 = vadd.f32 1.0, %v1602_v5  ;;  %v998_v9 = vpop.f32.mrb[13].mxu0  ;;  %v1007_v34 = vadd.f32 %v1444_v7, %v768_v36 }
 0x2fa   :  { %v1606_v10 = vpop.eup %1605  ;;  %1615 = vrcp.f32 %v1087_v6  ;;  %v1088_v11 = vadd.f32 1.0, %v1604_v8  ;;  %v1445_v12 = vpop.f32.mrb[14].mxu0  ;;  %v999_v14 = vadd.f32 %v998_v9, %v758_v30 }
 0x2fb   :  { %1617 = vrcp.f32 %v1085_v38  ;;  %v1086_v39 = vadd.f32 1.0, %v1606_v10  ;;  %v1001_v15 = vpop.f32.mrb[15].mxu0  ;;  %v1010_v16 = vadd.f32 %v1445_v12, %v773_v42 }
 0x2fc   :  { %1619 = vrcp.f32 %v1088_v11  ;;  %v1002_v18 = vadd.f32 %v1001_v15, %v763_v31 }
 0x2fd   :  { %1621 = vrcp.f32 %v1086_v39 }
 0x2fe   :  { %1623 = vtanh.f32 %v1007_v34 }
 0x2ff   :  { %v1608_v19 = vpop.eup %1607  ;;  %1625 = vtanh.f32 %v999_v14 }
 0x300   :  { %v1610_v21 = vpop.eup %1609  ;;  %v1091_v23 = vadd.f32 1.0, %v1608_v19  ;;  %1627 = vtanh.f32 %v1010_v16  ;;  %v1448_v24 = vpop.f32.mrb[16].mxu0 }
 0x301   :  { %v1612_v25 = vpop.eup %1611  ;;  %v1089_v27 = vadd.f32 1.0, %v1610_v21  ;;  %1629 = vtanh.f32 %v1002_v18  ;;  %v1014_v17 = vpop.f32.mrb[17].mxu0  ;;  %v1023_v33 = vadd.f32 %v1448_v24, %v788_v26 }
 0x302   :  { %v1614_v28 = vpop.eup %1613  ;;  %1631 = vrcp.f32 %v1091_v23  ;;  %v1092_v30 = vadd.f32 1.0, %v1612_v25  ;;  %v1449_v36 = vpop.f32.mrb[18].mxu0  ;;  %v1015_v40 = vadd.f32 %v1014_v17, %v778_v0 }
 0x303   :  { %1633 = vrcp.f32 %v1089_v27  ;;  %v1090_v31 = vadd.f32 1.0, %v1614_v28  ;;  %v1017_v41 = vpop.f32.mrb[19].mxu0  ;;  %v1026_v42 = vadd.f32 %v1449_v36, %v793_v56 }
 0x304   :  { %v1616_v37 = vpop.eup %1615  ;;  %1635 = vrcp.f32 %v1092_v30  ;;  %v1018_v44 = vadd.f32 %v1017_v41, %v783_v4 }
 0x305   :  { %v1618_v43 = vpop.eup %1617  ;;  %1637 = vrcp.f32 %v1090_v31 }
 0x306   :  { %v1620_v45 = vpop.eup %1619  ;;  %1639 = vtanh.f32 %v1023_v33 }
 0x307   :  { %v1622_v46 = vpop.eup %1621  ;;  %1641 = vtanh.f32 %v1015_v40 }
 0x308   :  { %v1624_v47 = vpop.eup %1623  ;;  %1643 = vtanh.f32 %v1026_v42  ;;  %v1452_v48 = vpop.f32.mrb[20].mxu0 }
 0x309   :  { %v1626_v49 = vpop.eup %1625  ;;  %v1167_v51 = vmul.f32 %v1624_v47, %v1616_v37  ;;  %1645 = vtanh.f32 %v1018_v44  ;;  %v1039_v53 = vadd.f32 %v1452_v48, %v2071_v22  ;;  %v1030_v55 = vpop.f32.mrb[21].mxu0 }
 0x30a   :  { %v1628_v57 = vpop.eup %1627  ;;  %v1165_v58 = vmul.f32 %v1626_v49, %v1618_v43  ;;  %v1031_v59 = vadd.f32 %v1030_v55, %v2067_v29  ;;  %v1453_v60 = vpop.f32.mrb[22].mxu0 }
 0x30b   :  { %v1630_v61 = vpop.eup %1629  ;;  %v1168_v62 = vmul.f32 %v1628_v57, %v1620_v45  ;;  %v1346_v63 = vmul.f32 -1.442695, %v1039_v53  ;;  %v1042_v0 = vadd.f32 %v1453_v60, %v2073_v32  ;;  %v1033_v1 = vpop.f32.mrb[23].mxu0 }
 0x30c   :  { %v1632_v2 = vpop.eup %1631  ;;  %v1166_v3 = vmul.f32 %v1630_v61, %v1622_v46  ;;  %v1344_v4 = vmul.f32 -1.442695, %v1031_v59  ;;  %v1034_v5 = vadd.f32 %v1033_v1, %v2069_v54 }
 0x30d   :  { %v1634_v6 = vpop.eup %1633  ;;  %v1347_v7 = vmul.f32 -1.442695, %v1042_v0  ;;  %1647 = vpow2.f32 %v1346_v63 }
 0x30e   :  { %v1636_v22 = vpop.eup %1635  ;;  %v1345_v8 = vmul.f32 -1.442695, %v1034_v5  ;;  %1649 = vpow2.f32 %v1344_v4 }
 0x30f   :  { %v1638_v38 = vpop.eup %1637  ;;  %1651 = vpow2.f32 %v1347_v7 }
 0x310   :  { %v1640_v9 = vpop.eup %1639  ;;  %v1456_v29 = vpop.f32.mrb[24].mxu0  ;;  %1653 = vpow2.f32 %v1345_v8 }
 0x311   :  { %v1642_v10 = vpop.eup %1641  ;;  %v1171_v11 = vmul.f32 %v1640_v9, %v1632_v2  ;;  %v1055_v32 = vadd.f32 %v1456_v29, %v2079_v13  ;;  %v1046_v34 = vpop.f32.mrb[25].mxu0  ;;  %1655 = vtanh.f32 %v1167_v51  ;;  %v1189_v29 = vld [vmem:[%s2117_s7] sm:$0x1]  ;;  %s1699_s7 = scalar_lea.vmem %s1261_s14, 16 }
 0x312   :  { %v1644_v12 = vpop.eup %1643  ;;  %v1169_v39 = vmul.f32 %v1642_v10, %v1634_v6  ;;  %v1047_v54 = vadd.f32 %v1046_v34, %v2075_v50  ;;  %v1457_v14 = vpop.f32.mrb[26].mxu0  ;;  %1657 = vtanh.f32 %v1165_v58  ;;  %v1200_v10 = vlaneseq  ;;  %p1700_p0 = scmp.ne.s32.totalorder %s1261_s14, %s1699_s7  ;;  %p1705_p2 = scmp.lt.s32.totalorder %s1703_s15, %s1699_s7 }
 0x313   :  { %v1646_v15 = vpop.eup %1645  ;;  %v1172_v16 = vmul.f32 %v1644_v12, %v1636_v22  ;;  %v1350_v18 = vmul.f32 -1.442695, %v1055_v32  ;;  %v1058_v19 = vadd.f32 %v1457_v14, %v2081_v35  ;;  %v1049_v21 = vpop.f32.mrb[27].mxu0  ;;  %1659 = vtanh.f32 %v1168_v62 }
 0x314   :  { %v1170_v23 = vmul.f32 %v1646_v15, %v1638_v38  ;;  %v1348_v24 = vmul.f32 -1.442695, %v1047_v54  ;;  %v1050_v25 = vadd.f32 %v1049_v21, %v2077_v52  ;;  %v1198_v34 = vpop.permute.xlu0 %1197  ;;  %p1706_p3 = por %p1705_p2, %p1704_p1 }
 0x315   :  { %v1351_v13 = vmul.f32 -1.442695, %v1058_v19  ;;  %1661 = vpow2.f32 %v1350_v18 }
 0x316   :  { %v1349_v26 = vmul.f32 -1.442695, %v1050_v25  ;;  %1663 = vpow2.f32 %v1348_v24  ;;  %p1707_p4 = pnand %p1706_p3, %p1700_p0 }
 0x317   :  { %v1648_v27 = vpop.eup %1647  ;;  %1665 = vpow2.f32 %v1351_v13 }
 0x318   :  { %v1650_v50 = vpop.eup %1649  ;;  %v1143_v17 = vadd.f32 1.0, %v1648_v27  ;;  %1667 = vpow2.f32 %v1349_v26 }
 0x319   :  { %v1652_v28 = vpop.eup %1651  ;;  %1669 = vtanh.f32 %v1166_v3  ;;  %v1141_v35 = vadd.f32 1.0, %v1650_v50 }
 0x31a   :  { %v1654_v30 = vpop.eup %1653  ;;  %1671 = vrcp.f32 %v1143_v17  ;;  %v1144_v33 = vadd.f32 1.0, %v1652_v28 }
 0x31b   :  { %1673 = vrcp.f32 %v1141_v35  ;;  %v1142_v36 = vadd.f32 1.0, %v1654_v30  ;;  %v1656_v52 = vpop.eup %1655 }
 0x31c   :  { %1675 = vrcp.f32 %v1144_v33  ;;  %v1658_v56 = vpop.eup %1657 }
 0x31d   :  { %1677 = vrcp.f32 %v1142_v36  ;;  %v1660_v31 = vpop.eup %1659 }
 0x31e   :  { %1679 = vtanh.f32 %v1171_v11  ;;  %v1201_v11 = vshrl.u32 %v1200_v10, 7 }
 0x31f   :  { %v1662_v40 = vpop.eup %1661  ;;  %1681 = vtanh.f32 %v1169_v39 }
 0x320   :  { %v1664_v41 = vpop.eup %1663  ;;  %1683 = vtanh.f32 %v1172_v16  ;;  %v1147_v37 = vadd.f32 1.0, %v1662_v40  ;;  %v1202_v32 = vsub.s32 0, %v1201_v11 }
 0x321   :  { %v1666_v42 = vpop.eup %1665  ;;  %1685 = vtanh.f32 %v1170_v23  ;;  %v1145_v43 = vadd.f32 1.0, %v1664_v41 }
 0x322   :  { %v1668_v44 = vpop.eup %1667  ;;  %1687 = vrcp.f32 %v1147_v37  ;;  %v1148_v45 = vadd.f32 1.0, %v1666_v42  ;;  %v1203_v12 = vrot.slane %v1198_v34, %v1202_v32 }
 0x323   :  { %v1670_v46 = vpop.eup %1669  ;;  %1689 = vrcp.f32 %v1145_v43  ;;  %v1146_v47 = vadd.f32 1.0, %v1668_v44 }
 0x324   :  { %v1672_v48 = vpop.eup %1671  ;;  %1691 = vrcp.f32 %v1148_v45 }
 0x325   :  { %v1674_v49 = vpop.eup %1673  ;;  %1693 = vrcp.f32 %v1146_v47  ;;  %v1183_v51 = vmul.f32 %v1672_v48, %v1656_v52 }
 0x326   :  { %v1676_v53 = vpop.eup %1675  ;;  %v1181_v55 = vmul.f32 %v1674_v49, %v1658_v56 }
 0x327   :  { %v1678_v57 = vpop.eup %1677  ;;  %v1184_v58 = vmul.f32 %v1676_v53, %v1660_v31 }
 0x328   :  { %v1680_v59 = vpop.eup %1679  ;;  %v1182_v60 = vmul.f32 %v1678_v57, %v1670_v46 }
 0x329   :  { %v1682_v61 = vpop.eup %1681  ;;  %v1191_v62 = vpack.c.bf16 %v1184_v58, %v1183_v51 }
 0x32a   :  { %v1684_v63 = vpop.eup %1683  ;;  %v1190_v0 = vpack.c.bf16 %v1182_v60, %v1181_v55 }
 0x32b   :  { %v1686_v1 = vpop.eup %1685 }
 0x32c   :  { %v1688_v2 = vpop.eup %1687  ;;  %1459 = vmatpush3.bf16.msra.mxu1 %v1190_v0 }
 0x32d   :  { %v1690_v3 = vpop.eup %1689  ;;  %1460 = vmatprep.subr.bf16.mxu1 %v1724_v20  ;;  %v1187_v4 = vmul.f32 %v1688_v2, %v1680_v59 }
 0x32e   :  { %v1692_v5 = vpop.eup %1691  ;;  %v1185_v6 = vmul.f32 %v1690_v3, %v1682_v61 }
 0x32f   :  { %v1694_v7 = vpop.eup %1693  ;;  %v1188_v22 = vmul.f32 %v1692_v5, %v1684_v63 }
 0x330   :  { %1461 = vmatpush3.bf16.msra.mxu1 %v1191_v62  ;;  %v1186_v8 = vmul.f32 %v1694_v7, %v1686_v1 }
 0x331   :  { %1462 = vmatprep.subr.bf16.mxu1 %v1724_v20  ;;  %v1193_v38 = vpack.c.bf16 %v1188_v22, %v1187_v4 }
 0x332   :  { %v1192_v9 = vpack.c.bf16 %v1186_v8, %v1185_v6 }
 0x334   :  { %1463 = vmatpush3.bf16.msra.mxu1 %v1192_v9 }
 0x335   :  { %1464 = vmatprep.subr.bf16.mxu1 %v1724_v20 }
 0x338   :  { %1465 = vmatpush3.bf16.msra.mxu1 %v1193_v38 }
 0x33b   :  { %1467 = vmatmul.mubr.msk.bf16.vlgmr.msra.gmra.mrb[24].mxu1 %vm895_vm3, %v1189_v29 }
 0x40e   :  { %v1241_v39 = vpop.f32.mrb[24].mxu1 }
 0x40f   :  { %v1242_v54 = vadd.f32 %v1241_v39, %v1203_v12  ;;  %v1468_v14 = vpop.f32.mrb[25].mxu1 }
 0x410   :  { %v1244_v15 = vpop.f32.mrb[26].mxu1 }
 0x411   :  { %v1353_v16 = vmul.f32 -1.442695, %v1242_v54  ;;  %v1469_v18 = vpop.f32.mrb[27].mxu1 }
 0x413   :  { %1695 = vpow2.f32 %v1353_v16 }
 0x41d   :  { %v1696_v20 = vpop.eup %1695 }
 0x41e   :  { %v1250_v19 = vadd.f32 1.0, %v1696_v20 }
 0x420   :  { %1697 = vrcp.f32 %v1250_v19 }
 0x42a   :  { %v1698_v21 = vpop.eup %1697 }
 0x42b   :  { %1253 = vst [vmem:[#allocation3] sm:$0x1] %v1698_v21 }
 0x42c   :  { %1710 = shalt.err (!%p1707_p4)
}
 0x42d   :  { %s1711_s3 = scalar_lea.hbm %s2119_s9, 16 }
 0x42e   :  { %p1712_p5 = scmp.ne.s32.totalorder %s2119_s9, %s1711_s3  ;;  %p1715_p6 = scmp.lt.u32.totalorder %s1711_s3, %s2119_s9 }
 0x430   :  { %p1717_p7 = pnand %p1715_p6, %p1712_p5 }
 0x432   :  { %1720 = shalt.err (!%p1717_p7)
}
 0x433   :  { %1263 = dma.vmem_to_hbm [thread:$0]  %s1261_s14, 16, %s2119_s9, [#allocation4]  }
 0x434   :  { %1721 = dma.done.wait [#allocation4], 16  }
 0x435   :  { %1722 = vsyncadd [#allocation4], 4294967280 }
 0x436   :  { %1267 = vsyncpa [#allocation4], 1 }

</bundles_post_ra>
